<compile_context>
chip_gen: v5e
topology: v5e:2x2
jax: 0.10.0
libtpu: 0.0.40
codegen_flags: <defaults>
</compile_context>

<pallas_src>
import jax
import jax.numpy as jnp
from jax import lax
from jax.experimental import pallas as pl
from jax.experimental.pallas import tpu as pltpu

LOG_STD_MAX = 2.0
LOG_STD_MIN = -20.0
LN_EPS = 1e-5


def _softplus(x):
    # numerically stable softplus (matches torch.nn.functional.softplus)
    return jnp.maximum(x, 0.0) + jnp.log1p(jnp.exp(-jnp.abs(x)))


def _soft_clip(x, min_v, max_v):
    out = max_v - _softplus(max_v - x)
    out = min_v + _softplus(out - min_v)
    return out


def _round_up(x, m):
    return ((x + m - 1) // m) * m


def _make_decoder_kernel(n_hidden, hidden_dims, ob_shape):
    """Feature-major kernel: n_hidden (Linear, LayerNorm, Tanh) blocks + heads."""

    def _ln_tanh(h, gamma, beta):
        # LayerNorm over the feature (sublane) axis; batch lanes independent.
        mean = jnp.mean(h, axis=0, keepdims=True)            # (1, tb)
        cent = h - mean
        var = jnp.mean(cent * cent, axis=0, keepdims=True)    # two-pass variance
        hn = cent * lax.rsqrt(var + LN_EPS)
        return jnp.tanh(hn * gamma + beta)

    def _partial_dots(w_refs, x_refs):
        # fused torch.cat: sum_i  W_i^T @ x_i^T  ->  (rows, tb)
        acc = None
        for wr, xr in zip(w_refs, x_refs):
            part = lax.dot_general(
                wr[...], xr[...].astype(jnp.float32),
                dimension_numbers=(((1,), (1,)), ((), ())),   # contract fan-in dims
                preferred_element_type=jnp.float32)
            acc = part if acc is None else acc + part
        return acc

    if n_hidden == 0:
        def kernel(*refs):
            x_refs = refs[0:4]
            wmu_refs = refs[4:8]
            wstd_refs = refs[8:12]
            vec_ref = refs[12]
            mu_ref, std_ref = refs[13], refs[14]

            mu_pre = _partial_dots(wmu_refs, x_refs) + vec_ref[0, :ob_shape, :]
            std_pre = _partial_dots(wstd_refs, x_refs) + vec_ref[1, :ob_shape, :]
            o_min = vec_ref[2, :ob_shape, :]
            o_max = vec_ref[3, :ob_shape, :]
            mu_ref[...] = _soft_clip(mu_pre, o_min, o_max).astype(mu_ref.dtype)
            log_std = _soft_clip(std_pre, LOG_STD_MIN, LOG_STD_MAX)
            std_ref[...] = (jnp.exp(log_std) + 1e-6).astype(std_ref.dtype)
        return kernel

    def kernel(*refs):
        idx = 0
        x_refs = refs[idx:idx + 4]; idx += 4               # four activation inputs
        wf_refs = refs[idx:idx + 4]; idx += 4              # split+transposed first weight
        w_rest = refs[idx:idx + n_hidden - 1]; idx += n_hidden - 1
        wmu_ref = refs[idx]; idx += 1                      # (ob, hd_last)
        wstd_ref = refs[idx]; idx += 1                     # (ob, hd_last)
        vec_ref = refs[idx]; idx += 1                      # packed column table
        mu_ref, std_ref = refs[idx], refs[idx + 1]

        hd0 = hidden_dims[0]
        h = _partial_dots(wf_refs, x_refs) + vec_ref[0, :hd0, :]     # (hd0, tb)
        h = _ln_tanh(h, vec_ref[1, :hd0, :], vec_ref[2, :hd0, :])

        for l in range(1, n_hidden):
            hd = hidden_dims[l]
            h = jnp.dot(w_rest[l - 1][...], h, preferred_element_type=jnp.float32)
            h = h + vec_ref[3 * l, :hd, :]
            h = _ln_tanh(h, vec_ref[3 * l + 1, :hd, :], vec_ref[3 * l + 2, :hd, :])

        base = 3 * n_hidden
        mu_pre = (jnp.dot(wmu_ref[...], h, preferred_element_type=jnp.float32)
                  + vec_ref[base, :ob_shape, :])
        std_pre = (jnp.dot(wstd_ref[...], h, preferred_element_type=jnp.float32)
                   + vec_ref[base + 1, :ob_shape, :])
        o_min = vec_ref[base + 2, :ob_shape, :]
        o_max = vec_ref[base + 3, :ob_shape, :]

        mu_ref[...] = _soft_clip(mu_pre, o_min, o_max).astype(mu_ref.dtype)
        log_std = _soft_clip(std_pre, LOG_STD_MIN, LOG_STD_MAX)
        std_ref[...] = (jnp.exp(log_std) + 1e-6).astype(std_ref.dtype)   # exp only on std

    return kernel


def transition_decoder_forward(rnn_output, transition_predict, ob_real_emb, ac,
                               params, *, batch_tile=1024):
    """Pallas implementation of TransitionDecoder.forward -> (mu, std)."""
    xs = [rnn_output, transition_predict, ob_real_emb, ac]   # no wrapper-side casts
    in_dims = [int(x.shape[-1]) for x in xs]
    batch = int(xs[0].shape[0])
    input_dim = sum(in_dims)

    hidden = params["hidden"]
    n_hidden = len(hidden)
    hidden_dims = tuple(int(w.shape[1]) for (w, _, _, _) in hidden)
    ob_shape = int(params["wmu"].shape[1])

    # Reference construction never updates last_dim: every hidden Linear has
    # fan-in == input_dim, so chaining requires fan_in(layer l) == hidden_dims[l-1].
    for l in range(1, n_hidden):
        if int(hidden[l][0].shape[0]) != hidden_dims[l - 1]:
            raise ValueError(
                "TransitionDecoder reference never updates last_dim; hidden layer "
                f"{l} fan-in {hidden[l][0].shape[0]} != previous hidden dim "
                f"{hidden_dims[l - 1]} -> forward cannot chain.")

    # ---- packed per-feature vector table, stored as columns (n_cols, max_dim, 1) ----
    max_dim = max(hidden_dims + (ob_shape,)) if n_hidden else ob_shape

    def _col(v):
        v = jnp.asarray(v, jnp.float32).reshape(-1)
        return jnp.pad(v, (0, max_dim - v.shape[0]))

    cols = []
    for (_, b, g, be) in hidden:
        cols += [_col(b), _col(g), _col(be)]
    cols += [_col(params["bmu"]), _col(params["bstd"]),
             _col(params["obs_min"]), _col(params["obs_max"])]
    vecs = jnp.stack(cols)[:, :, None]                       # (n_cols, max_dim, 1)

    # ---- transposed weights (feature-major W^T @ x^T); fuse torch.cat by
    #      splitting the first fan-in row-wise per input ----
    if n_hidden >= 1:
        first_w = hidden[0][0]
        if int(first_w.shape[0]) != input_dim:
            raise ValueError("first-layer fan-in must equal sum of input dims")
        splits, off = [], 0
        for d in in_dims:
            splits.append(jnp.transpose(first_w[off:off + d, :]).astype(jnp.float32))
            off += d
        w_rest = [jnp.transpose(hidden[l][0]).astype(jnp.float32)
                  for l in range(1, n_hidden)]
        heads = [jnp.transpose(params["wmu"]).astype(jnp.float32),
                 jnp.transpose(params["wstd"]).astype(jnp.float32)]
        weight_inputs = splits + w_rest + heads + [vecs]
    else:
        if int(params["wmu"].shape[0]) != input_dim:
            raise ValueError("head fan-in must equal sum of input dims")
        mu_splits, std_splits, off = [], [], 0
        for d in in_dims:
            mu_splits.append(jnp.transpose(params["wmu"][off:off + d, :]).astype(jnp.float32))
            std_splits.append(jnp.transpose(params["wstd"][off:off + d, :]).astype(jnp.float32))
            off += d
        weight_inputs = mu_splits + std_splits + [vecs]

    # ---- batch tiling: big lane-dense tiles, ragged last block, >=2 grid
    #      steps when possible (v7x has 2 TensorCores) ----
    tb_cap = _round_up(max(batch_tile, 128), 128)
    if batch <= 128:
        tb = batch                                   # single exact block
    else:
        rb = _round_up(batch, 128)
        tb = min(tb_cap, rb)
        if rb >= 256:
            tb = min(tb, _round_up(rb // 2, 128))    # at least 2 grid steps
    grid = (pl.cdiv(batch, tb),)

    act_specs = [pl.BlockSpec((tb, d), lambda i: (i, 0)) for d in in_dims]

    def _resident(a):
        nd = a.ndim
        return pl.BlockSpec(a.shape, lambda i, _nd=nd: (0,) * _nd)

    in_specs = act_specs + [_resident(a) for a in weight_inputs]
    out_specs = (pl.BlockSpec((ob_shape, tb), lambda i: (0, i)),
                 pl.BlockSpec((ob_shape, tb), lambda i: (0, i)))
    out_shape = (jax.ShapeDtypeStruct((ob_shape, batch), jnp.float32),
                 jax.ShapeDtypeStruct((ob_shape, batch), jnp.float32))

    kernel = _make_decoder_kernel(n_hidden, hidden_dims, ob_shape)
    mu_t, std_t = pl.pallas_call(
        kernel,
        grid=grid,
        out_shape=out_shape,
        in_specs=in_specs,
        out_specs=out_specs,
        compiler_params=pltpu.CompilerParams(
            dimension_semantics=("parallel",)),
    )(*xs, *weight_inputs)

    # tiny layout transpose back to the PyTorch (batch, ob_shape) convention
    return mu_t.T, std_t.T


def _linear_init(key, fan_in, fan_out):
    """Deterministic init mimicking torch.nn.Linear default (U[-1/sqrt(in), 1/sqrt(in)])."""
    kw, kb = jax.random.split(key)
    bound = 1.0 / jnp.sqrt(fan_in)
    w = jax.random.uniform(kw, (fan_in, fan_out), jnp.float32, -bound, bound)
    b = jax.random.uniform(kb, (fan_out,), jnp.float32, -bound, bound)
    return w, b


def init_params(key, input_dim, hidden_dims, ob_shape, obs_min, obs_max):
    keys = jax.random.split(key, len(hidden_dims) + 2)
    hidden = []
    last_dim = input_dim  # NOTE: reference code never updates last_dim in the loop
    for i, hdim in enumerate(hidden_dims):
        w, b = _linear_init(keys[i], last_dim, hdim)
        gamma = jnp.ones((hdim,), jnp.float32)   # LayerNorm default affine
        beta = jnp.zeros((hdim,), jnp.float32)
        hidden.append((w, b, gamma, beta))
    out_in = hidden_dims[-1] if len(hidden_dims) != 0 else input_dim
    wmu, bmu = _linear_init(keys[-2], out_in, ob_shape)
    wstd, bstd = _linear_init(keys[-1], out_in, ob_shape)
    return {
        "hidden": hidden,
        "wmu": wmu, "bmu": bmu,
        "wstd": wstd, "bstd": bstd,
        "obs_min": jnp.asarray(obs_min, jnp.float32),
        "obs_max": jnp.asarray(obs_max, jnp.float32),
    }


def _reference_forward(rnn_output, transition_predict, ob_real_emb, ac, params):
    """Pure-JAX reference for correctness checking."""
    x = jnp.concatenate([rnn_output, transition_predict, ob_real_emb, ac], -1)
    h = x.astype(jnp.float32)
    for (w, b, g, beta) in params["hidden"]:
        h = h @ w + b
        mean = jnp.mean(h, -1, keepdims=True)
        var = jnp.mean((h - mean) ** 2, -1, keepdims=True)
        h = (h - mean) / jnp.sqrt(var + LN_EPS) * g + beta
        h = jnp.tanh(h)
    mu = _soft_clip(h @ params["wmu"] + params["bmu"],
                    params["obs_min"], params["obs_max"])
    log_std = _soft_clip(h @ params["wstd"] + params["bstd"],
                         LOG_STD_MIN, LOG_STD_MAX)
    return mu, jnp.exp(log_std) + 1e-6


if __name__ == "__main__":
    key = jax.random.PRNGKey(0)
    k_rnn, k_tp, k_emb, k_ac, k_params, k_big = jax.random.split(key, 6)

    batch = 8
    rnn_dim, tp_dim, emb_dim, ac_dim = 16, 8, 16, 8
    input_dim = rnn_dim + tp_dim + emb_dim + ac_dim   # 48
    hidden_dims = (32,)
    ob_shape = 12

    rnn_output = jax.random.normal(k_rnn, (batch, rnn_dim), jnp.float32)
    transition_predict = jax.random.normal(k_tp, (batch, tp_dim), jnp.float32)
    ob_real_emb = jax.random.normal(k_emb, (batch, emb_dim), jnp.float32)
    ac = jax.random.normal(k_ac, (batch, ac_dim), jnp.float32)

    obs_min = -1.5 * jnp.ones((ob_shape,), jnp.float32)
    obs_max = 1.5 * jnp.ones((ob_shape,), jnp.float32)

    params = init_params(k_params, input_dim, hidden_dims, ob_shape,
                         obs_min, obs_max)

    mu, std = transition_decoder_forward(
        rnn_output, transition_predict, ob_real_emb, ac, params)
    jax.block_until_ready((mu, std))

    mu_ref, std_ref = _reference_forward(
        rnn_output, transition_predict, ob_real_emb, ac, params)
    assert mu.shape == (batch, ob_shape) and std.shape == (batch, ob_shape)
    assert jnp.allclose(mu, mu_ref, atol=1e-4, rtol=1e-4)
    assert jnp.allclose(std, std_ref, atol=1e-4, rtol=1e-4)

    # ragged multi-tile batch: exercises the partial last block and a 2-step grid
    batch2 = 272
    ks = jax.random.split(k_big, 4)
    xs2 = [jax.random.normal(ks[0], (batch2, rnn_dim), jnp.float32),
           jax.random.normal(ks[1], (batch2, tp_dim), jnp.float32),
           jax.random.normal(ks[2], (batch2, emb_dim), jnp.float32),
           jax.random.normal(ks[3], (batch2, ac_dim), jnp.float32)]
    mu2, std2 = transition_decoder_forward(*xs2, params)
    jax.block_until_ready((mu2, std2))
    mu2_ref, std2_ref = _reference_forward(*xs2, params)
    assert jnp.allclose(mu2, mu2_ref, atol=1e-4, rtol=1e-4)
    assert jnp.allclose(std2, std2_ref, atol=1e-4, rtol=1e-4)

    print("KERNEL_OK")
</pallas_src>

<mosaic_0001>
module attributes {stable_mosaic.version = 11 : i64} {
  func.func @kernel(%arg0: i32, %arg1: memref<8x16xf32, #tpu.memory_space<vmem>>, %arg2: memref<8x8xf32, #tpu.memory_space<vmem>>, %arg3: memref<8x16xf32, #tpu.memory_space<vmem>>, %arg4: memref<8x8xf32, #tpu.memory_space<vmem>>, %arg5: memref<32x16xf32, #tpu.memory_space<vmem>>, %arg6: memref<32x8xf32, #tpu.memory_space<vmem>>, %arg7: memref<32x16xf32, #tpu.memory_space<vmem>>, %arg8: memref<32x8xf32, #tpu.memory_space<vmem>>, %arg9: memref<12x32xf32, #tpu.memory_space<vmem>>, %arg10: memref<12x32xf32, #tpu.memory_space<vmem>>, %arg11: memref<7x32x1xf32, #tpu.memory_space<vmem>>, %arg12: memref<12x8xf32, #tpu.memory_space<vmem>>, %arg13: memref<12x8xf32, #tpu.memory_space<vmem>>) attributes {dimension_semantics = [#tpu.dimension_semantics<parallel>], iteration_bounds = array<i64: 1>, scalar_prefetch = 0 : i64, scratch_operands = 0 : i64, tpu.core_type = #tpu.core_type<tc>, window_params = [{transform_indices = @transform_0, window_bounds = array<i64: 8, 16>}, {transform_indices = @transform_1, window_bounds = array<i64: 8, 8>}, {transform_indices = @transform_2, window_bounds = array<i64: 8, 16>}, {transform_indices = @transform_3, window_bounds = array<i64: 8, 8>}, {pipeline_mode = #tpu.pipeline_mode<synchronous>, transform_indices = @transform_4, window_bounds = array<i64: 32, 16>}, {pipeline_mode = #tpu.pipeline_mode<synchronous>, transform_indices = @transform_5, window_bounds = array<i64: 32, 8>}, {pipeline_mode = #tpu.pipeline_mode<synchronous>, transform_indices = @transform_6, window_bounds = array<i64: 32, 16>}, {pipeline_mode = #tpu.pipeline_mode<synchronous>, transform_indices = @transform_7, window_bounds = array<i64: 32, 8>}, {pipeline_mode = #tpu.pipeline_mode<synchronous>, transform_indices = @transform_8, window_bounds = array<i64: 12, 32>}, {pipeline_mode = #tpu.pipeline_mode<synchronous>, transform_indices = @transform_9, window_bounds = array<i64: 12, 32>}, {pipeline_mode = #tpu.pipeline_mode<synchronous>, transform_indices = @transform_10, window_bounds = array<i64: 7, 32, 1>}, {transform_indices = @transform_11, window_bounds = array<i64: 12, 8>}, {transform_indices = @transform_12, window_bounds = array<i64: 12, 8>}]} {
    %c0 = arith.constant 0 : index
    %c0_0 = arith.constant 0 : index
    %0 = vector.load %arg5[%c0, %c0_0] : memref<32x16xf32, #tpu.memory_space<vmem>>, vector<32x16xf32>
    %c0_1 = arith.constant 0 : index
    %c0_2 = arith.constant 0 : index
    %1 = vector.load %arg1[%c0_1, %c0_2] : memref<8x16xf32, #tpu.memory_space<vmem>>, vector<8x16xf32>
    %cst = arith.constant dense<0.000000e+00> : vector<32x8xf32>
    %2 = tpu.matmul %0, %1, %cst {dimension_numbers = #tpu.dot_dimension_numbers<[1], [1], [0], [0], [0, 0, 1, 0], [], []>} : vector<32x16xf32>, vector<8x16xf32>, vector<32x8xf32> -> vector<32x8xf32>
    %c0_3 = arith.constant 0 : index
    %c0_4 = arith.constant 0 : index
    %3 = vector.load %arg6[%c0_3, %c0_4] : memref<32x8xf32, #tpu.memory_space<vmem>>, vector<32x8xf32>
    %c0_5 = arith.constant 0 : index
    %c0_6 = arith.constant 0 : index
    %4 = vector.load %arg2[%c0_5, %c0_6] : memref<8x8xf32, #tpu.memory_space<vmem>>, vector<8x8xf32>
    %cst_7 = arith.constant dense<0.000000e+00> : vector<32x8xf32>
    %5 = tpu.matmul %3, %4, %cst_7 {dimension_numbers = #tpu.dot_dimension_numbers<[1], [1], [0], [0], [0, 0, 1, 0], [], []>} : vector<32x8xf32>, vector<8x8xf32>, vector<32x8xf32> -> vector<32x8xf32>
    %6 = arith.addf %2, %5 : vector<32x8xf32>
    %c0_8 = arith.constant 0 : index
    %c0_9 = arith.constant 0 : index
    %7 = vector.load %arg7[%c0_8, %c0_9] : memref<32x16xf32, #tpu.memory_space<vmem>>, vector<32x16xf32>
    %c0_10 = arith.constant 0 : index
    %c0_11 = arith.constant 0 : index
    %8 = vector.load %arg3[%c0_10, %c0_11] : memref<8x16xf32, #tpu.memory_space<vmem>>, vector<8x16xf32>
    %cst_12 = arith.constant dense<0.000000e+00> : vector<32x8xf32>
    %9 = tpu.matmul %7, %8, %cst_12 {dimension_numbers = #tpu.dot_dimension_numbers<[1], [1], [0], [0], [0, 0, 1, 0], [], []>} : vector<32x16xf32>, vector<8x16xf32>, vector<32x8xf32> -> vector<32x8xf32>
    %10 = arith.addf %6, %9 : vector<32x8xf32>
    %c0_13 = arith.constant 0 : index
    %c0_14 = arith.constant 0 : index
    %11 = vector.load %arg8[%c0_13, %c0_14] : memref<32x8xf32, #tpu.memory_space<vmem>>, vector<32x8xf32>
    %c0_15 = arith.constant 0 : index
    %c0_16 = arith.constant 0 : index
    %12 = vector.load %arg4[%c0_15, %c0_16] : memref<8x8xf32, #tpu.memory_space<vmem>>, vector<8x8xf32>
    %cst_17 = arith.constant dense<0.000000e+00> : vector<32x8xf32>
    %13 = tpu.matmul %11, %12, %cst_17 {dimension_numbers = #tpu.dot_dimension_numbers<[1], [1], [0], [0], [0, 0, 1, 0], [], []>} : vector<32x8xf32>, vector<8x8xf32>, vector<32x8xf32> -> vector<32x8xf32>
    %14 = arith.addf %10, %13 : vector<32x8xf32>
    %c0_18 = arith.constant 0 : index
    %c0_19 = arith.constant 0 : index
    %c0_20 = arith.constant 0 : index
    %15 = vector.load %arg11[%c0_18, %c0_19, %c0_20] : memref<7x32x1xf32, #tpu.memory_space<vmem>>, vector<1x32x1xf32>
    %16 = vector.shape_cast %15 : vector<1x32x1xf32> to vector<32x1xf32>
    %17 = vector.broadcast %16 : vector<32x1xf32> to vector<32x8xf32>
    %18 = arith.addf %14, %17 : vector<32x8xf32>
    %c1 = arith.constant 1 : index
    %c0_21 = arith.constant 0 : index
    %c0_22 = arith.constant 0 : index
    %19 = vector.load %arg11[%c1, %c0_21, %c0_22] : memref<7x32x1xf32, #tpu.memory_space<vmem>>, vector<1x32x1xf32>
    %20 = vector.shape_cast %19 : vector<1x32x1xf32> to vector<32x1xf32>
    %c2 = arith.constant 2 : index
    %c0_23 = arith.constant 0 : index
    %c0_24 = arith.constant 0 : index
    %21 = vector.load %arg11[%c2, %c0_23, %c0_24] : memref<7x32x1xf32, #tpu.memory_space<vmem>>, vector<1x32x1xf32>
    %22 = vector.shape_cast %21 : vector<1x32x1xf32> to vector<32x1xf32>
    %cst_25 = arith.constant dense<0.000000e+00> : vector<8xf32>
    %23 = vector.multi_reduction <add>, %18, %cst_25 [0] : vector<32x8xf32> to vector<8xf32>
    %24 = vector.shape_cast %23 : vector<8xf32> to vector<1x8xf32>
    %cst_26 = arith.constant 3.200000e+01 : f32
    %25 = vector.broadcast %cst_26 : f32 to vector<1x8xf32>
    %26 = arith.divf %24, %25 : vector<1x8xf32>
    %27 = vector.broadcast %26 : vector<1x8xf32> to vector<32x8xf32>
    %28 = arith.subf %18, %27 : vector<32x8xf32>
    %29 = arith.mulf %28, %28 : vector<32x8xf32>
    %cst_27 = arith.constant dense<0.000000e+00> : vector<8xf32>
    %30 = vector.multi_reduction <add>, %29, %cst_27 [0] : vector<32x8xf32> to vector<8xf32>
    %31 = vector.shape_cast %30 : vector<8xf32> to vector<1x8xf32>
    %cst_28 = arith.constant 3.200000e+01 : f32
    %32 = vector.broadcast %cst_28 : f32 to vector<1x8xf32>
    %33 = arith.divf %31, %32 : vector<1x8xf32>
    %cst_29 = arith.constant 9.99999974E-6 : f32
    %34 = vector.broadcast %cst_29 : f32 to vector<1x8xf32>
    %35 = arith.addf %33, %34 : vector<1x8xf32>
    %36 = math.rsqrt %35 : vector<1x8xf32>
    %37 = vector.broadcast %36 : vector<1x8xf32> to vector<32x8xf32>
    %38 = arith.mulf %28, %37 : vector<32x8xf32>
    %39 = vector.broadcast %20 : vector<32x1xf32> to vector<32x8xf32>
    %40 = arith.mulf %38, %39 : vector<32x8xf32>
    %41 = vector.broadcast %22 : vector<32x1xf32> to vector<32x8xf32>
    %42 = arith.addf %40, %41 : vector<32x8xf32>
    %43 = math.tanh %42 : vector<32x8xf32>
    %c0_30 = arith.constant 0 : index
    %c0_31 = arith.constant 0 : index
    %44 = vector.load %arg9[%c0_30, %c0_31] : memref<12x32xf32, #tpu.memory_space<vmem>>, vector<12x32xf32>
    %cst_32 = arith.constant dense<0.000000e+00> : vector<12x8xf32>
    %45 = tpu.matmul %44, %43, %cst_32 {dimension_numbers = #tpu.dot_dimension_numbers<[1], [0], [0], [1], [0, 0, 1, 1], [], []>} : vector<12x32xf32>, vector<32x8xf32>, vector<12x8xf32> -> vector<12x8xf32>
    %c3 = arith.constant 3 : index
    %c0_33 = arith.constant 0 : index
    %c0_34 = arith.constant 0 : index
    %46 = vector.load %arg11[%c3, %c0_33, %c0_34] : memref<7x32x1xf32, #tpu.memory_space<vmem>>, vector<1x12x1xf32>
    %47 = vector.shape_cast %46 : vector<1x12x1xf32> to vector<12x1xf32>
    %48 = vector.broadcast %47 : vector<12x1xf32> to vector<12x8xf32>
    %49 = arith.addf %45, %48 : vector<12x8xf32>
    %c0_35 = arith.constant 0 : index
    %c0_36 = arith.constant 0 : index
    %50 = vector.load %arg10[%c0_35, %c0_36] : memref<12x32xf32, #tpu.memory_space<vmem>>, vector<12x32xf32>
    %cst_37 = arith.constant dense<0.000000e+00> : vector<12x8xf32>
    %51 = tpu.matmul %50, %43, %cst_37 {dimension_numbers = #tpu.dot_dimension_numbers<[1], [0], [0], [1], [0, 0, 1, 1], [], []>} : vector<12x32xf32>, vector<32x8xf32>, vector<12x8xf32> -> vector<12x8xf32>
    %c4 = arith.constant 4 : index
    %c0_38 = arith.constant 0 : index
    %c0_39 = arith.constant 0 : index
    %52 = vector.load %arg11[%c4, %c0_38, %c0_39] : memref<7x32x1xf32, #tpu.memory_space<vmem>>, vector<1x12x1xf32>
    %53 = vector.shape_cast %52 : vector<1x12x1xf32> to vector<12x1xf32>
    %54 = vector.broadcast %53 : vector<12x1xf32> to vector<12x8xf32>
    %55 = arith.addf %51, %54 : vector<12x8xf32>
    %c5 = arith.constant 5 : index
    %c0_40 = arith.constant 0 : index
    %c0_41 = arith.constant 0 : index
    %56 = vector.load %arg11[%c5, %c0_40, %c0_41] : memref<7x32x1xf32, #tpu.memory_space<vmem>>, vector<1x12x1xf32>
    %57 = vector.shape_cast %56 : vector<1x12x1xf32> to vector<12x1xf32>
    %c6 = arith.constant 6 : index
    %c0_42 = arith.constant 0 : index
    %c0_43 = arith.constant 0 : index
    %58 = vector.load %arg11[%c6, %c0_42, %c0_43] : memref<7x32x1xf32, #tpu.memory_space<vmem>>, vector<1x12x1xf32>
    %59 = vector.shape_cast %58 : vector<1x12x1xf32> to vector<12x1xf32>
    %60 = vector.broadcast %59 : vector<12x1xf32> to vector<12x8xf32>
    %61 = arith.subf %60, %49 : vector<12x8xf32>
    %cst_44 = arith.constant 0.000000e+00 : f32
    %62 = vector.broadcast %cst_44 : f32 to vector<12x8xf32>
    %63 = arith.maximumf %61, %62 : vector<12x8xf32>
    %64 = math.absf %61 : vector<12x8xf32>
    %cst_45 = arith.constant 0.000000e+00 : f32
    %65 = vector.broadcast %cst_45 : f32 to vector<12x8xf32>
    %66 = arith.subf %65, %64 : vector<12x8xf32>
    %67 = math.exp %66 : vector<12x8xf32>
    %68 = math.log1p %67 : vector<12x8xf32>
    %69 = arith.addf %63, %68 : vector<12x8xf32>
    %70 = vector.broadcast %59 : vector<12x1xf32> to vector<12x8xf32>
    %71 = arith.subf %70, %69 : vector<12x8xf32>
    %72 = vector.broadcast %57 : vector<12x1xf32> to vector<12x8xf32>
    %73 = arith.subf %71, %72 : vector<12x8xf32>
    %cst_46 = arith.constant 0.000000e+00 : f32
    %74 = vector.broadcast %cst_46 : f32 to vector<12x8xf32>
    %75 = arith.maximumf %73, %74 : vector<12x8xf32>
    %76 = math.absf %73 : vector<12x8xf32>
    %cst_47 = arith.constant 0.000000e+00 : f32
    %77 = vector.broadcast %cst_47 : f32 to vector<12x8xf32>
    %78 = arith.subf %77, %76 : vector<12x8xf32>
    %79 = math.exp %78 : vector<12x8xf32>
    %80 = math.log1p %79 : vector<12x8xf32>
    %81 = arith.addf %75, %80 : vector<12x8xf32>
    %82 = vector.broadcast %57 : vector<12x1xf32> to vector<12x8xf32>
    %83 = arith.addf %82, %81 : vector<12x8xf32>
    %c0_48 = arith.constant 0 : index
    %c0_49 = arith.constant 0 : index
    %84 = vector.load %arg12[%c0_48, %c0_49] : memref<12x8xf32, #tpu.memory_space<vmem>>, vector<12x8xf32>
    tpu.vector_store %arg12[%c0_48, %c0_49], %83 {strides = array<i32>} : memref<12x8xf32, #tpu.memory_space<vmem>>, vector<12x8xf32>,
    %cst_50 = arith.constant 2.000000e+00 : f32
    %85 = vector.broadcast %cst_50 : f32 to vector<12x8xf32>
    %86 = arith.subf %85, %55 : vector<12x8xf32>
    %cst_51 = arith.constant 0.000000e+00 : f32
    %87 = vector.broadcast %cst_51 : f32 to vector<12x8xf32>
    %88 = arith.maximumf %86, %87 : vector<12x8xf32>
    %89 = math.absf %86 : vector<12x8xf32>
    %cst_52 = arith.constant 0.000000e+00 : f32
    %90 = vector.broadcast %cst_52 : f32 to vector<12x8xf32>
    %91 = arith.subf %90, %89 : vector<12x8xf32>
    %92 = math.exp %91 : vector<12x8xf32>
    %93 = math.log1p %92 : vector<12x8xf32>
    %94 = arith.addf %88, %93 : vector<12x8xf32>
    %cst_53 = arith.constant 2.000000e+00 : f32
    %95 = vector.broadcast %cst_53 : f32 to vector<12x8xf32>
    %96 = arith.subf %95, %94 : vector<12x8xf32>
    %cst_54 = arith.constant -2.000000e+01 : f32
    %97 = vector.broadcast %cst_54 : f32 to vector<12x8xf32>
    %98 = arith.subf %96, %97 : vector<12x8xf32>
    %cst_55 = arith.constant 0.000000e+00 : f32
    %99 = vector.broadcast %cst_55 : f32 to vector<12x8xf32>
    %100 = arith.maximumf %98, %99 : vector<12x8xf32>
    %101 = math.absf %98 : vector<12x8xf32>
    %cst_56 = arith.constant 0.000000e+00 : f32
    %102 = vector.broadcast %cst_56 : f32 to vector<12x8xf32>
    %103 = arith.subf %102, %101 : vector<12x8xf32>
    %104 = math.exp %103 : vector<12x8xf32>
    %105 = math.log1p %104 : vector<12x8xf32>
    %106 = arith.addf %100, %105 : vector<12x8xf32>
    %cst_57 = arith.constant -2.000000e+01 : f32
    %107 = vector.broadcast %cst_57 : f32 to vector<12x8xf32>
    %108 = arith.addf %107, %106 : vector<12x8xf32>
    %109 = math.exp %108 : vector<12x8xf32>
    %cst_58 = arith.constant 9.99999997E-7 : f32
    %110 = vector.broadcast %cst_58 : f32 to vector<12x8xf32>
    %111 = arith.addf %109, %110 : vector<12x8xf32>
    %c0_59 = arith.constant 0 : index
    %c0_60 = arith.constant 0 : index
    %112 = vector.load %arg13[%c0_59, %c0_60] : memref<12x8xf32, #tpu.memory_space<vmem>>, vector<12x8xf32>
    tpu.vector_store %arg13[%c0_59, %c0_60], %111 {strides = array<i32>} : memref<12x8xf32, #tpu.memory_space<vmem>>, vector<12x8xf32>,
    return
  }
  func.func @transform_0(%arg0: i32) -> (i32, i32) {
    %c0_i32 = arith.constant 0 : i32
    %c0_i32_0 = arith.constant 0 : i32
    return %arg0, %c0_i32 : i32, i32
  }
  func.func @transform_1(%arg0: i32) -> (i32, i32) {
    %c0_i32 = arith.constant 0 : i32
    %c0_i32_0 = arith.constant 0 : i32
    return %arg0, %c0_i32 : i32, i32
  }
  func.func @transform_2(%arg0: i32) -> (i32, i32) {
    %c0_i32 = arith.constant 0 : i32
    %c0_i32_0 = arith.constant 0 : i32
    return %arg0, %c0_i32 : i32, i32
  }
  func.func @transform_3(%arg0: i32) -> (i32, i32) {
    %c0_i32 = arith.constant 0 : i32
    %c0_i32_0 = arith.constant 0 : i32
    return %arg0, %c0_i32 : i32, i32
  }
  func.func @transform_4(%arg0: i32) -> (i32, i32) {
    %c0_i32 = arith.constant 0 : i32
    %c0_i32_0 = arith.constant 0 : i32
    %c0_i32_1 = arith.constant 0 : i32
    return %c0_i32, %c0_i32_0 : i32, i32
  }
  func.func @transform_5(%arg0: i32) -> (i32, i32) {
    %c0_i32 = arith.constant 0 : i32
    %c0_i32_0 = arith.constant 0 : i32
    %c0_i32_1 = arith.constant 0 : i32
    return %c0_i32, %c0_i32_0 : i32, i32
  }
  func.func @transform_6(%arg0: i32) -> (i32, i32) {
    %c0_i32 = arith.constant 0 : i32
    %c0_i32_0 = arith.constant 0 : i32
    %c0_i32_1 = arith.constant 0 : i32
    return %c0_i32, %c0_i32_0 : i32, i32
  }
  func.func @transform_7(%arg0: i32) -> (i32, i32) {
    %c0_i32 = arith.constant 0 : i32
    %c0_i32_0 = arith.constant 0 : i32
    %c0_i32_1 = arith.constant 0 : i32
    return %c0_i32, %c0_i32_0 : i32, i32
  }
  func.func @transform_8(%arg0: i32) -> (i32, i32) {
    %c0_i32 = arith.constant 0 : i32
    %c0_i32_0 = arith.constant 0 : i32
    %c0_i32_1 = arith.constant 0 : i32
    return %c0_i32, %c0_i32_0 : i32, i32
  }
  func.func @transform_9(%arg0: i32) -> (i32, i32) {
    %c0_i32 = arith.constant 0 : i32
    %c0_i32_0 = arith.constant 0 : i32
    %c0_i32_1 = arith.constant 0 : i32
    return %c0_i32, %c0_i32_0 : i32, i32
  }
  func.func @transform_10(%arg0: i32) -> (i32, i32, i32) {
    %c0_i32 = arith.constant 0 : i32
    %c0_i32_0 = arith.constant 0 : i32
    %c0_i32_1 = arith.constant 0 : i32
    %c0_i32_2 = arith.constant 0 : i32
    return %c0_i32, %c0_i32_0, %c0_i32_1 : i32, i32, i32
  }
  func.func @transform_11(%arg0: i32) -> (i32, i32) {
    %c0_i32 = arith.constant 0 : i32
    %c0_i32_0 = arith.constant 0 : i32
    return %c0_i32, %arg0 : i32, i32
  }
  func.func @transform_12(%arg0: i32) -> (i32, i32) {
    %c0_i32 = arith.constant 0 : i32
    %c0_i32_0 = arith.constant 0 : i32
    return %c0_i32, %arg0 : i32, i32
  }
}

</mosaic_0001>

<bundles_post_ra>
// kernel: tpu_custom_call.1
= control target key start
LH: loop header
LB: loop body
LE: loop exit
PB: predicated region body
PF: predicated region fallthrough
CT: control target
= control target key end

     0   :  { %vm50_vm0 = vcmask 64512   ;;  %vm95_vm1 = vcmask 130048   ;;  %v761_v0 = vmov 0   ;;  %vm409_vm6 = vcmask 261120   ;;  %s1049_s10 = inlined_call_operand.vmem [shape: f32[7,32,1], index: 10, kind: input, shape index: {}]   ;;  %s1050_s1 = inlined_call_operand.vmem [shape: f32[8,8], index: 1, kind: input, shape index: {}]   ;;  %s1051_s0 = inlined_call_operand.vmem [shape: f32[8,16], index: 0, kind: input, shape index: {}]   ;;  %s1052_s5 = inlined_call_operand.vmem [shape: f32[32,8], index: 5, kind: input, shape index: {}]   ;;  %s1053_s4 = inlined_call_operand.vmem [shape: f32[32,16], index: 4, kind: input, shape index: {}]   ;;  %s1054_s2 = inlined_call_operand.vmem [shape: f32[8,16], index: 2, kind: input, shape index: {}]   ;;  %s1055_s3 = inlined_call_operand.vmem [shape: f32[8,8], index: 3, kind: input, shape index: {}]   ;;  %s1056_s6 = inlined_call_operand.vmem [shape: f32[32,16], index: 6, kind: input, shape index: {}]   ;;  %s1057_s7 = inlined_call_operand.vmem [shape: f32[32,8], index: 7, kind: input, shape index: {}]   ;;  %s1058_s8 = inlined_call_operand.vmem [shape: f32[12,32], index: 8, kind: input, shape index: {}]   ;;  %s1059_s9 = inlined_call_operand.vmem [shape: f32[12,32], index: 9, kind: input, shape index: {}]   ;;  %s1060_s11 = inlined_call_operand.vmem [shape: f32[12,8], index: 11, kind: output, shape index: {0}]   ;;  %s1061_s12 = inlined_call_operand.vmem [shape: f32[12,8], index: 12, kind: output, shape index: {1}]  }
   0x1   :  { %711 = vset.pattern.permute.xlu1 %v761_v0  ;;  %710 = vset.pattern.permute.xlu0 %v761_v0  ;;  %v248_v1 = vld [vmem:[%s1049_s10 + $0x10] sm:$0xff]  ;;  %v246_v2 = vld [vmem:[%s1049_s10] sm:$0xff]  ;;  %v48_v5 = vld [vmem:[%s1052_s5 + $0x18] sm:$0xff]  ;;  %vm578_vm14 = vcmask 60416  }
   0x2   :  { %v49_v3 = vld [vmem:[%s1050_s1] sm:$0xff]  ;;  %262 = vperm.xlu1 %711, %v248_v1   ;;  %252 = vperm.xlu0 %710, %v246_v2   ;;  %v43_v6 = vld [vmem:[%s1053_s4 + $0x18] sm:$0xff]  ;;  %v247_v12 = vld [vmem:[%s1049_s10 + $0x8] sm:$0xff] }
   0x3   :  { %v44_v4 = vld [vmem:[%s1051_s0] sm:$0xff]  ;;  %706 = vmatpush.xpose.msk.msra.mxu2 %vm50_vm0, %v49_v3  ;;  %664 = vmatpush.xpose.msk.msra.mxu0 %vm50_vm0, %v49_v3  ;;  %v249_v11 = vld [vmem:[%s1049_s10 + $0x18] sm:$0xff]  ;;  %v46_v15 = vld [vmem:[%s1052_s5 + $0x8] sm:$0xff] }
   0x4   :  { %707 = vmatpush.xpose.msk.msra.mxu3 %vm95_vm1, %v44_v4  ;;  %v144_v7 = vld [vmem:[%s1054_s2] sm:$0xff]  ;;  %669 = vmatpush.xpose.msk.msra.mxu1 %vm95_vm1, %v44_v4  ;;  %v41_v16 = vld [vmem:[%s1053_s4 + $0x8] sm:$0xff]  ;;  %v691_v18 = vld [vmem:[%s1049_s10 + $0x58] sm:$0xff] }
   0x5   :  { %v197_v8 = vld [vmem:[%s1055_s3] sm:$0xff]  ;;  %712 = vset.pattern.permute.xlu2 %v761_v0  ;;  %v685_v17 = vld [vmem:[%s1049_s10 + $0x28] sm:$0xff]  ;;  %v687_v19 = vld [vmem:[%s1049_s10 + $0x38] sm:$0xff]  ;;  %v762_v0 = vmov 32.0  }
   0x6   :  { %v45_v9 = vld [vmem:[%s1052_s5] sm:$0xff]  ;;  %668 = vmatmul.msk.f32.vlgmr.msra.gmra.mxu2 %vm50_vm0, %v48_v5  ;;  %v141_v20 = vld [vmem:[%s1056_s6 + $0x8] sm:$0xff]  ;;  %359 = vperm.xlu2 %712, %v687_v19   ;;  %v47_v22 = vld [vmem:[%s1052_s5 + $0x10] sm:$0xff]  ;;  %713 = vrcp.f32 %v762_v0 }
   0x7   :  { %674 = vmatpush.xpose.msk.msrb.mxu2 %vm95_vm1, %v144_v7  ;;  %v40_v10 = vld [vmem:[%s1053_s4] sm:$0xff]  ;;  %673 = vmatmul.msk.f32.vlgmr.msra.gmra.mxu3 %vm95_vm1, %v43_v6  ;;  %v194_v21 = vld [vmem:[%s1057_s7 + $0x8] sm:$0xff]  ;;  %v42_v23 = vld [vmem:[%s1053_s4 + $0x10] sm:$0xff] }
   0x8   :  { %679 = vmatpush.xpose.msk.msrb.mxu3 %vm50_vm0, %v197_v8  ;;  %665 = vmatmul.msk.f32.vlgmr.msra.gmra.mxu0 %vm50_vm0, %v45_v9  ;;  %v140_v13 = vld [vmem:[%s1056_s6] sm:$0xff]  ;;  %v689_v24 = vld [vmem:[%s1049_s10 + $0x48] sm:$0xff]  ;;  %v686_v26 = vld [vmem:[%s1049_s10 + $0x30] sm:$0xff] }
   0x9   :  { %670 = vmatmul.msk.f32.vlgmr.msra.gmra.mxu1 %vm95_vm1, %v40_v10  ;;  %v193_v14 = vld [vmem:[%s1057_s7] sm:$0xff]  ;;  %v142_v27 = vld [vmem:[%s1056_s6 + $0x10] sm:$0xff]  ;;  %v697_v29 = vld [vmem:[%s1049_s10 + $0x88] sm:$0xf] }
   0xa   :  { %267 = vperm.xlu1 %711, %v249_v11   ;;  %257 = vperm.xlu0 %710, %v247_v12   ;;  %v684_v25 = vld [vmem:[%s1049_s10 + $0x20] sm:$0xff]  ;;  %v195_v28 = vld [vmem:[%s1057_s7 + $0x10] sm:$0xff]  ;;  %v143_v32 = vld [vmem:[%s1056_s6 + $0x18] sm:$0xff] }
   0xb   :  { %v696_v30 = vld [vmem:[%s1049_s10 + $0x80] sm:$0xff]  ;;  %v690_v31 = vld [vmem:[%s1049_s10 + $0x50] sm:$0xff]  ;;  %v196_v33 = vld [vmem:[%s1057_s7 + $0x18] sm:$0xff] }
   0xc   :  { %v702_v34 = vld [vmem:[%s1049_s10 + $0xc0] sm:$0xff]  ;;  %v693_v35 = vld [vmem:[%s1049_s10 + $0x68] sm:$0xf]  ;;  %v714_v8 = vpop.eup %713 }
   0xd   :  { %v701_v36 = vld [vmem:[%s1049_s10 + $0xa8] sm:$0xf]  ;;  %v700_v37 = vld [vmem:[%s1049_s10 + $0xa0] sm:$0xff]  ;;  %vm302_vm2 = vweird.f32 %v714_v8 }
   0xe   :  { %675 = vmatmul.msk.f32.vlgmr.msrb.gmra.mxu2 %vm95_vm1, %v140_v13  ;;  %354 = vperm.xlu2 %712, %v686_v26   ;;  %v688_v38 = vld [vmem:[%s1049_s10 + $0x40] sm:$0xff]  ;;  %v703_v40 = vld [vmem:[%s1049_s10 + $0xc8] sm:$0xf] }
   0xf   :  { %680 = vmatmul.msk.f32.vlgmr.msrb.gmra.mxu3 %vm50_vm0, %v193_v14  ;;  %v692_v39 = vld [vmem:[%s1049_s10 + $0x60] sm:$0xff] }
  0x10   :  { %666 = vmatmul.msk.f32.gmra.mxu0 %vm50_vm0, %v46_v15 }
  0x11   :  { %671 = vmatmul.msk.f32.gmra.mxu1 %vm95_vm1, %v41_v16  ;;  %v298_v16 = vmul.f32 32.0, %v714_v8 }
  0x12   :  { %349 = vperm.xlu1 %711, %v685_v17   ;;  %383 = vperm.xlu0 %710, %v691_v18  }
  0x16   :  { %676 = vmatmul.msk.f32.gmra.mxu2 %vm95_vm1, %v141_v20  ;;  %378 = vperm.xlu2 %712, %v690_v31  }
  0x17   :  { %681 = vmatmul.msk.f32.gmra.mxu3 %vm50_vm0, %v194_v21 }
  0x18   :  { %667 = vmatmul.msk.f32.gmra.mxu0 %vm50_vm0, %v47_v22  ;;  %v299_v22 = vsub.f32 1.0, %v298_v16 }
  0x19   :  { %672 = vmatmul.msk.f32.gmra.mxu1 %vm95_vm1, %v42_v23 }
  0x1a   :  { %373 = vperm.xlu1 %711, %v689_v24   ;;  %344 = vperm.xlu0 %710, %v684_v25   ;;  %v300_v25 = vmul.f32 %v714_v8, %v299_v22 }
  0x1e   :  { %677 = vmatmul.msk.f32.gmra.mxu2 %vm95_vm1, %v142_v27  ;;  %368 = vperm.xlu2 %712, %v688_v38  }
  0x1f   :  { %682 = vmatmul.msk.f32.gmra.mxu3 %vm50_vm0, %v195_v28  ;;  %v301_v28 = vadd.f32 %v714_v8, %v300_v25 }
  0x21   :  { %v303_v31 = vsel %vm302_vm2, %v714_v8, %v301_v28 }
  0x22   :  { %451 = vperm.xlu1 %711, %v697_v29   ;;  %446 = vperm.xlu0 %710, %v696_v30  }
  0x26   :  { %678 = vmatmul.msk.f32.gmra.mxu2 %vm95_vm1, %v143_v32  ;;  %401 = vperm.xlu2 %712, %v692_v39  }
  0x27   :  { %683 = vmatmul.msk.f32.gmra.mxu3 %vm50_vm0, %v196_v33 }
  0x2a   :  { %491 = vperm.xlu1 %711, %v702_v34   ;;  %406 = vperm.xlu0 %710, %v693_v35  }
  0x2e   :  { %496 = vperm.xlu2 %712, %v703_v40  }
  0x32   :  { %540 = vperm.xlu1 %711, %v701_v36   ;;  %535 = vperm.xlu0 %710, %v700_v37  }
  0x74   :  { %v253_v51 = vpop.permute.xlu0 %252  ;;  %v263_v63 = vpop.permute.xlu1 %262 }
  0x7c   :  { %v258_v3 = vpop.permute.xlu0 %257  ;;  %v268_v17 = vpop.permute.xlu1 %267 }
  0x84   :  { %v350_v0 = vpop.permute.xlu1 %349 }
  0x85   :  { %v83_v41 = vpop.f32.mrf.mxu0 }
  0x86   :  { %v128_v42 = vpop.f32.mrf.mxu1 }
  0x87   :  { %v129_v55 = vadd.f32 %v128_v42, %v83_v41 }
  0x89   :  { %v92_v43 = vpop.f32.mrf.mxu2 }
  0x8a   :  { %v137_v44 = vpop.f32.mrf.mxu3 }
  0x8b   :  { %v138_v5 = vadd.f32 %v137_v44, %v92_v43 }
  0x8c   :  { %v374_v16 = vpop.permute.xlu1 %373 }
  0x8d   :  { %v86_v45 = vpop.f32.mrf.mxu0 }
  0x8e   :  { %v131_v46 = vpop.f32.mrf.mxu1 }
  0x8f   :  { %v132_v52 = vadd.f32 %v131_v46, %v86_v45 }
  0x91   :  { %v177_v47 = vpop.f32.mrf.mxu2 }
  0x92   :  { %v230_v48 = vpop.f32.mrf.mxu3  ;;  %v189_v58 = vadd.f32 %v177_v47, %v129_v55  ;;  %v360_v55 = vpop.permute.xlu2 %359 }
  0x94   :  { %v242_v1 = vadd.f32 %v230_v48, %v189_v58  ;;  %v452_v28 = vpop.permute.xlu1 %451 }
  0x95   :  { %v89_v53 = vpop.f32.mrf.mxu0 }
  0x96   :  { %v134_v54 = vpop.f32.mrf.mxu1  ;;  %v270_v6 = vadd.f32 %v253_v51, %v242_v1 }
  0x97   :  { %v135_v57 = vadd.f32 %v134_v54, %v89_v53 }
  0x98   :  { %v284_v13 = vsel %vm50_vm0, %v270_v6, 0.0 }
  0x99   :  { %v180_v49 = vpop.f32.mrf.mxu2 }
  0x9a   :  { %v233_v50 = vpop.f32.mrf.mxu3  ;;  %v190_v56 = vadd.f32 %v180_v49, %v132_v52  ;;  %v355_v58 = vpop.permute.xlu2 %354 }
  0x9c   :  { %v243_v61 = vadd.f32 %v233_v50, %v190_v56 }
  0x9e   :  { %v271_v4 = vadd.f32 %v258_v3, %v243_v61 }
  0xa0   :  { %v285_v11 = vsel %vm50_vm0, %v271_v4, 0.0 }
  0xa1   :  { %v183_v59 = vpop.f32.mrf.mxu2  ;;  %v286_v18 = vadd.f32 %v285_v11, %v284_v13 }
  0xa2   :  { %v236_v60 = vpop.f32.mrf.mxu3  ;;  %v191_v62 = vadd.f32 %v183_v59, %v135_v57  ;;  %v379_v3 = vpop.permute.xlu2 %378 }
  0xa4   :  { %v244_v2 = vadd.f32 %v236_v60, %v191_v62  ;;  %v384_v62 = vpop.permute.xlu0 %383 }
  0xa6   :  { %v272_v7 = vadd.f32 %v263_v63, %v244_v2 }
  0xa8   :  { %v287_v14 = vsel %vm50_vm0, %v272_v7, 0.0 }
  0xa9   :  { %v186_v9 = vpop.f32.mrf.mxu2  ;;  %v288_v20 = vadd.f32 %v287_v14, %v286_v18 }
  0xaa   :  { %v239_v10 = vpop.f32.mrf.mxu3  ;;  %v192_v12 = vadd.f32 %v186_v9, %v138_v5  ;;  %v369_v18 = vpop.permute.xlu2 %368 }
  0xac   :  { %v245_v15 = vadd.f32 %v239_v10, %v192_v12  ;;  %v345_v12 = vpop.permute.xlu0 %344 }
  0xae   :  { %v273_v19 = vadd.f32 %v268_v17, %v245_v15 }
  0xb0   :  { %v289_v21 = vsel %vm50_vm0, %v273_v19, 0.0 }
  0xb1   :  { %v290_v23 = vadd.f32 %v289_v21, %v288_v20 }
  0xb3   :  { %v291_v24 = vrot.slane %v290_v23, 4 }
  0xb5   :  { %v292_v26 = vadd.f32 %v291_v24, %v290_v23  ;;  %v394_v23 = vld [vmem:[%s1058_s8] sm:$0xff] }
  0xb6   :  { %v439_v24 = vld [vmem:[%s1059_s9] sm:$0xff] }
  0xb7   :  { %v293_v27 = vrot.slane %v292_v26, 2 }
  0xb9   :  { %v294_v29 = vadd.f32 %v293_v27, %v292_v26  ;;  %v395_v26 = vld [vmem:[%s1058_s8 + $0x8] sm:$0xf] }
  0xba   :  { %v440_v27 = vld [vmem:[%s1059_s9 + $0x8] sm:$0xf] }
  0xbb   :  { %v295_v30 = vrot.slane %v294_v29, 1 }
  0xbd   :  { %v296_v32 = vadd.f32 %v295_v30, %v294_v29  ;;  %v447_v29 = vpop.permute.xlu0 %446  ;;  %v402_v30 = vpop.permute.xlu2 %401 }
  0xbf   :  { %v304_v33 = vmul.f32 %v303_v31, %v296_v32 }
  0xc1   :  { %v307_v34 = vsub.f32 %v272_v7, %v304_v33  ;;  %v305_v35 = vsub.f32 %v270_v6, %v304_v33  ;;  %v306_v36 = vsub.f32 %v271_v4, %v304_v33  ;;  %v308_v37 = vsub.f32 %v273_v19, %v304_v33 }
  0xc3   :  { %v309_v38 = vmul.f32 %v305_v35, %v305_v35  ;;  %v310_v39 = vmul.f32 %v306_v36, %v306_v36  ;;  %v311_v40 = vmul.f32 %v307_v34, %v307_v34  ;;  %v312_v41 = vmul.f32 %v308_v37, %v308_v37 }
  0xc5   :  { %v313_v42 = vsel %vm50_vm0, %v309_v38, 0.0  ;;  %v314_v43 = vsel %vm50_vm0, %v310_v39, 0.0  ;;  %v316_v45 = vsel %vm50_vm0, %v311_v40, 0.0  ;;  %v318_v47 = vsel %vm50_vm0, %v312_v41, 0.0  ;;  %v407_v40 = vpop.permute.xlu0 %406 }
  0xc6   :  { %v315_v44 = vadd.f32 %v314_v43, %v313_v42 }
  0xc8   :  { %v317_v46 = vadd.f32 %v316_v45, %v315_v44 }
  0xca   :  { %v319_v48 = vadd.f32 %v318_v47, %v317_v46 }
  0xcc   :  { %v320_v49 = vrot.slane %v319_v48, 4 }
  0xce   :  { %v321_v50 = vadd.f32 %v320_v49, %v319_v48  ;;  %v995_v49 = vpop.permute.xlu2 %496 }
  0xd0   :  { %v322_v51 = vrot.slane %v321_v50, 2 }
  0xd2   :  { %v323_v52 = vadd.f32 %v322_v51, %v321_v50 }
  0xd4   :  { %v324_v53 = vrot.slane %v323_v52, 1 }
  0xd6   :  { %v325_v54 = vadd.f32 %v324_v53, %v323_v52 }
  0xd8   :  { %v326_v56 = vmul.f32 %v325_v54, %v303_v31 }
  0xda   :  { %v327_v57 = vadd.f32 1e-05, %v326_v56 }
  0xdc   :  { %715 = vrsqrt.f32 %v327_v57  ;;  %vm334_vm4 = vweird.f32 %v327_v57 }
  0xe2   :  { %v716_v59 = vpop.eup %715 }
  0xe3   :  { %v329_v60 = vmul.f32 %v716_v59, %v327_v57  ;;  %vm335_vm3 = vweird.f32 %v716_v59 }
  0xe4   :  { %vm336_vm5 = vmor %vm334_vm4, %vm335_vm3 }
  0xe5   :  { %v330_v61 = vmul.f32 %v716_v59, %v329_v60 }
  0xe7   :  { %v331_v63 = vmul.f32 0.5, %v330_v61 }
  0xe9   :  { %v332_v1 = vsub.f32 1.5, %v331_v63 }
  0xeb   :  { %v333_v2 = vmul.f32 %v716_v59, %v332_v1 }
  0xed   :  { %v337_v4 = vsel %vm336_vm5, %v716_v59, %v333_v2 }
  0xee   :  { %v339_v5 = vmul.f32 %v337_v4, %v306_v36  ;;  %v341_v6 = vmul.f32 %v337_v4, %v308_v37  ;;  %v340_v7 = vmul.f32 %v337_v4, %v307_v34  ;;  %v338_v8 = vmul.f32 %v337_v4, %v305_v35  ;;  %v990_v35 = vpop.permute.xlu1 %491 }
  0xf0   :  { %v365_v9 = vmul.f32 %v360_v55, %v341_v6  ;;  %v364_v10 = vmul.f32 %v355_v58, %v340_v7  ;;  %v363_v11 = vmul.f32 %v350_v0, %v339_v5  ;;  %v362_v15 = vmul.f32 %v345_v12, %v338_v8 }
  0xf2   :  { %v389_v13 = vadd.f32 %v384_v62, %v365_v9  ;;  %v388_v14 = vadd.f32 %v379_v3, %v364_v10  ;;  %v387_v17 = vadd.f32 %v374_v16, %v363_v11  ;;  %v386_v19 = vadd.f32 %v369_v18, %v362_v15 }
  0xf4   :  { %717 = vtanh.f32 %v389_v13 }
  0xf5   :  { %719 = vtanh.f32 %v388_v14 }
  0xf6   :  { %721 = vtanh.f32 %v387_v17 }
  0xf7   :  { %723 = vtanh.f32 %v386_v19 }
  0xfa   :  { %v718_v20 = vpop.eup %717 }
  0xfb   :  { %428 = vmatpush.msrb.mxu0 %v718_v20  ;;  %472 = vmatpush.msrb.mxu1 %v718_v20  ;;  %v720_v21 = vpop.eup %719 }
  0xfc   :  { %v722_v22 = vpop.eup %721 }
  0xfd   :  { %429 = vmatpush.msrb.mxu0 %v720_v21  ;;  %473 = vmatpush.msrb.mxu1 %v720_v21  ;;  %v724_v25 = vpop.eup %723 }
  0xff   :  { %430 = vmatpush.msrb.mxu0 %v722_v22  ;;  %474 = vmatpush.msrb.mxu1 %v722_v22 }
 0x101   :  { %431 = vmatpush.msrb.mxu0 %v724_v25  ;;  %475 = vmatpush.msrb.mxu1 %v724_v25  ;;  %v1005_v25 = vpop.permute.xlu0 %535 }
 0x102   :  { %694 = vmatmul.msk.f32.vlgmr.msrb.gmra.mxu0 %vm409_vm6, %v394_v23  ;;  %698 = vmatmul.msk.f32.vlgmr.msrb.gmra.mxu1 %vm409_vm6, %v439_v24 }
 0x10a   :  { %695 = vmatmul.msk.f32.gmra.mxu0 %vm409_vm6, %v395_v26  ;;  %699 = vmatmul.msk.f32.gmra.mxu1 %vm409_vm6, %v440_v27 }
 0x17f   :  { %v433_v31 = vpop.f32.mrf.mxu0  ;;  %v477_v32 = vpop.f32.mrf.mxu1 }
 0x180   :  { %v434_v33 = vadd.f32 %v433_v31, %v402_v30  ;;  %v478_v34 = vadd.f32 %v477_v32, %v447_v29 }
 0x182   :  { %v499_v36 = vsub.f32 %v990_v35, %v434_v33  ;;  %v580_v37 = vsub.f32 2.0, %v478_v34 }
 0x184   :  { %v503_v38 = vand.u32 2147483647, %v499_v36  ;;  %v584_v39 = vand.u32 2147483647, %v580_v37  ;;  %v501_v8 = vmax.f32 %v499_v36, 0.0  ;;  %v582_v16 = vmax.f32 %v580_v37, 0.0 }
 0x186   :  { %v505_v41 = vsub.f32 0.0, %v503_v38  ;;  %v586_v42 = vsub.f32 0.0, %v584_v39 }
 0x187   :  { %v436_v43 = vpop.f32.mrf.mxu0  ;;  %v480_v44 = vpop.f32.mrf.mxu1 }
 0x188   :  { %v507_v45 = vmul.f32 1.442695, %v505_v41  ;;  %v588_v46 = vmul.f32 1.442695, %v586_v42  ;;  %v437_v47 = vadd.f32 %v436_v43, %v407_v40  ;;  %v993_v48 = vadd.f32 %v480_v44, %v452_v28 }
 0x18a   :  { %725 = vpow2.f32 %v507_v45  ;;  %v998_v50 = vsub.f32 %v995_v49, %v437_v47  ;;  %v581_v51 = vsub.f32 2.0, %v993_v48 }
 0x18b   :  { %727 = vpow2.f32 %v588_v46 }
 0x18c   :  { %v504_v52 = vand.u32 2147483647, %v998_v50  ;;  %v585_v53 = vand.u32 2147483647, %v581_v51  ;;  %v502_v36 = vmax.f32 %v998_v50, 0.0  ;;  %v583_v44 = vmax.f32 %v581_v51, 0.0 }
 0x18e   :  { %v506_v54 = vsub.f32 0.0, %v504_v52  ;;  %v587_v55 = vsub.f32 0.0, %v585_v53  ;;  %v1018_v52 = vpop.permute.xlu1 %540 }
 0x190   :  { %v726_v56 = vpop.eup %725  ;;  %v509_v57 = vmul.f32 1.442695, %v506_v54  ;;  %v590_v60 = vmul.f32 1.442695, %v587_v55 }
 0x191   :  { %v728_v58 = vpop.eup %727  ;;  %v511_v59 = vadd.f32 1.0, %v726_v56  ;;  %v514_v61 = vmul.f32 -0.5, %v726_v56  ;;  %v517_v1 = vand.u32 2147483647, %v726_v56 }
 0x192   :  { %v592_v62 = vadd.f32 1.0, %v728_v58  ;;  %729 = vpow2.f32 %v509_v57  ;;  %v595_v63 = vmul.f32 -0.5, %v728_v58  ;;  %v598_v4 = vand.u32 2147483647, %v728_v58 }
 0x193   :  { %731 = vlog2.f32 %v511_v59  ;;  %v515_v0 = vadd.f32 1.0, %v514_v61  ;;  %vm518_vm7 = vcmp.lt.f32.partialorder %v517_v1, 0.0004427343 }
 0x194   :  { %733 = vlog2.f32 %v592_v62  ;;  %v596_v2 = vadd.f32 1.0, %v595_v63  ;;  %vm599_vm8 = vcmp.lt.f32.partialorder %v598_v4, 0.0004427343 }
 0x195   :  { %735 = vpow2.f32 %v590_v60  ;;  %v516_v10 = vmul.f32 %v726_v56, %v515_v0 }
 0x196   :  { %v597_v14 = vmul.f32 %v728_v58, %v596_v2 }
 0x198   :  { %v730_v3 = vpop.eup %729 }
 0x199   :  { %v732_v5 = vpop.eup %731  ;;  %v520_v6 = vadd.f32 1.0, %v730_v3  ;;  %v523_v11 = vmul.f32 -0.5, %v730_v3  ;;  %v526_v24 = vand.u32 2147483647, %v730_v3 }
 0x19a   :  { %v734_v7 = vpop.eup %733  ;;  %v513_v9 = vmul.f32 0.6931472, %v732_v5 }
 0x19b   :  { %v736_v12 = vpop.eup %735  ;;  %v594_v13 = vmul.f32 0.6931472, %v734_v7  ;;  %737 = vlog2.f32 %v520_v6  ;;  %v524_v22 = vadd.f32 1.0, %v523_v11  ;;  %vm527_vm9 = vcmp.lt.f32.partialorder %v526_v24, 0.0004427343 }
 0x19c   :  { %v519_v15 = vsel %vm518_vm7, %v516_v10, %v513_v9  ;;  %v601_v17 = vadd.f32 1.0, %v736_v12  ;;  %v604_v20 = vmul.f32 -0.5, %v736_v12  ;;  %v607_v33 = vand.u32 2147483647, %v736_v12 }
 0x19d   :  { %v529_v18 = vadd.f32 %v519_v15, %v501_v8  ;;  %v600_v19 = vsel %vm599_vm8, %v597_v14, %v594_v13  ;;  %v525_v32 = vmul.f32 %v730_v3, %v524_v22 }
 0x19e   :  { %v610_v21 = vadd.f32 %v600_v19, %v582_v16  ;;  %739 = vlog2.f32 %v601_v17  ;;  %v605_v29 = vadd.f32 1.0, %v604_v20  ;;  %vm608_vm10 = vcmp.lt.f32.partialorder %v607_v33, 0.0004427343 }
 0x19f   :  { %v531_v23 = vsub.f32 %v990_v35, %v529_v18 }
 0x1a0   :  { %v612_v26 = vsub.f32 2.0, %v610_v21  ;;  %v606_v42 = vmul.f32 %v736_v12, %v605_v29 }
 0x1a1   :  { %v738_v27 = vpop.eup %737  ;;  %v1008_v28 = vsub.f32 %v531_v23, %v1005_v25 }
 0x1a2   :  { %v1010_v30 = vadd.f32 20.0, %v612_v26  ;;  %v522_v31 = vmul.f32 0.6931472, %v738_v27 }
 0x1a3   :  { %v547_v34 = vand.u32 2147483647, %v1008_v28  ;;  %v545_v10 = vmax.f32 %v1008_v28, 0.0 }
 0x1a4   :  { %v740_v35 = vpop.eup %739  ;;  %v618_v37 = vand.u32 2147483647, %v1010_v30  ;;  %v528_v38 = vsel %vm527_vm9, %v525_v32, %v522_v31  ;;  %v616_v18 = vmax.f32 %v1010_v30, 0.0 }
 0x1a5   :  { %v549_v39 = vsub.f32 0.0, %v547_v34  ;;  %v530_v40 = vadd.f32 %v528_v38, %v502_v36  ;;  %v603_v41 = vmul.f32 0.6931472, %v740_v35 }
 0x1a6   :  { %v620_v43 = vsub.f32 0.0, %v618_v37 }
 0x1a7   :  { %v551_v45 = vmul.f32 1.442695, %v549_v39  ;;  %v532_v46 = vsub.f32 %v995_v49, %v530_v40  ;;  %v609_v47 = vsel %vm608_vm10, %v606_v42, %v603_v41 }
 0x1a8   :  { %v622_v50 = vmul.f32 1.442695, %v620_v43  ;;  %v611_v53 = vadd.f32 %v609_v47, %v583_v44 }
 0x1a9   :  { %741 = vpow2.f32 %v551_v45  ;;  %v1021_v54 = vsub.f32 %v532_v46, %v1018_v52 }
 0x1aa   :  { %743 = vpow2.f32 %v622_v50  ;;  %v613_v55 = vsub.f32 2.0, %v611_v53 }
 0x1ab   :  { %v548_v56 = vand.u32 2147483647, %v1021_v54  ;;  %v546_v36 = vmax.f32 %v1021_v54, 0.0 }
 0x1ac   :  { %v1024_v57 = vadd.f32 20.0, %v613_v55 }
 0x1ad   :  { %v550_v48 = vsub.f32 0.0, %v548_v56 }
 0x1ae   :  { %v619_v51 = vand.u32 2147483647, %v1024_v57  ;;  %v617_v40 = vmax.f32 %v1024_v57, 0.0 }
 0x1af   :  { %v742_v58 = vpop.eup %741  ;;  %v553_v49 = vmul.f32 1.442695, %v550_v48 }
 0x1b0   :  { %v744_v59 = vpop.eup %743  ;;  %v555_v60 = vadd.f32 1.0, %v742_v58  ;;  %v621_v61 = vsub.f32 0.0, %v619_v51  ;;  %v558_v62 = vmul.f32 -0.5, %v742_v58  ;;  %v561_v3 = vand.u32 2147483647, %v742_v58 }
 0x1b1   :  { %v626_v63 = vadd.f32 1.0, %v744_v59  ;;  %745 = vpow2.f32 %v553_v49  ;;  %v629_v0 = vmul.f32 -0.5, %v744_v59  ;;  %v632_v6 = vand.u32 2147483647, %v744_v59 }
 0x1b2   :  { %747 = vlog2.f32 %v555_v60  ;;  %v624_v1 = vmul.f32 1.442695, %v621_v61  ;;  %v559_v2 = vadd.f32 1.0, %v558_v62  ;;  %vm562_vm11 = vcmp.lt.f32.partialorder %v561_v3, 0.0004427343 }
 0x1b3   :  { %749 = vlog2.f32 %v626_v63  ;;  %v630_v4 = vadd.f32 1.0, %v629_v0  ;;  %vm633_vm12 = vcmp.lt.f32.partialorder %v632_v6, 0.0004427343 }
 0x1b4   :  { %751 = vpow2.f32 %v624_v1  ;;  %v560_v12 = vmul.f32 %v742_v58, %v559_v2 }
 0x1b5   :  { %v631_v16 = vmul.f32 %v744_v59, %v630_v4 }
 0x1b7   :  { %v746_v5 = vpop.eup %745 }
 0x1b8   :  { %v748_v7 = vpop.eup %747  ;;  %v564_v8 = vadd.f32 1.0, %v746_v5  ;;  %v567_v13 = vmul.f32 -0.5, %v746_v5  ;;  %v570_v27 = vand.u32 2147483647, %v746_v5 }
 0x1b9   :  { %v750_v9 = vpop.eup %749  ;;  %v557_v11 = vmul.f32 0.6931472, %v748_v7 }
 0x1ba   :  { %v752_v14 = vpop.eup %751  ;;  %v628_v15 = vmul.f32 0.6931472, %v750_v9  ;;  %753 = vlog2.f32 %v564_v8  ;;  %v568_v24 = vadd.f32 1.0, %v567_v13  ;;  %vm571_vm13 = vcmp.lt.f32.partialorder %v570_v27, 0.0004427343 }
 0x1bb   :  { %v563_v17 = vsel %vm562_vm11, %v560_v12, %v557_v11  ;;  %v635_v19 = vadd.f32 1.0, %v752_v14  ;;  %v638_v22 = vmul.f32 -0.5, %v752_v14  ;;  %v641_v34 = vand.u32 2147483647, %v752_v14 }
 0x1bc   :  { %v573_v20 = vadd.f32 %v563_v17, %v545_v10  ;;  %v634_v21 = vsel %vm633_vm12, %v631_v16, %v628_v15  ;;  %v569_v33 = vmul.f32 %v746_v5, %v568_v24 }
 0x1bd   :  { %v644_v23 = vadd.f32 %v634_v21, %v616_v18  ;;  %755 = vlog2.f32 %v635_v19  ;;  %v639_v31 = vadd.f32 1.0, %v638_v22  ;;  %vm642_vm15 = vcmp.lt.f32.partialorder %v641_v34, 0.0004427343 }
 0x1be   :  { %v575_v26 = vadd.f32 %v573_v20, %v1005_v25 }
 0x1bf   :  { %v646_v28 = vadd.f32 -20.0, %v644_v23  ;;  %v640_v39 = vmul.f32 %v752_v14, %v639_v31 }
 0x1c0   :  { %v754_v29 = vpop.eup %753  ;;  %577 = vst.msk [vmem:[%s1060_s11] sm:$0xff] %vm50_vm0, %v575_v26 }
 0x1c1   :  { %v648_v30 = vmul.f32 1.442695, %v646_v28  ;;  %v566_v32 = vmul.f32 0.6931472, %v754_v29 }
 0x1c3   :  { %v756_v35 = vpop.eup %755  ;;  %757 = vpow2.f32 %v648_v30  ;;  %v572_v37 = vsel %vm571_vm13, %v569_v33, %v566_v32 }
 0x1c4   :  { %v574_v25 = vadd.f32 %v572_v37, %v546_v36  ;;  %v637_v38 = vmul.f32 0.6931472, %v756_v35 }
 0x1c6   :  { %v576_v41 = vadd.f32 %v574_v25, %v1018_v52  ;;  %v643_v42 = vsel %vm642_vm15, %v640_v39, %v637_v38 }
 0x1c7   :  { %v645_v43 = vadd.f32 %v643_v42, %v617_v40 }
 0x1c8   :  { %579 = vst.msk [vmem:[%s1060_s11 + $0x8] sm:$0xf] %vm578_vm14, %v576_v41 }
 0x1c9   :  { %v758_v44 = vpop.eup %757  ;;  %v647_v45 = vadd.f32 -20.0, %v645_v43 }
 0x1ca   :  { %v652_v46 = vadd.f32 1e-06, %v758_v44 }
 0x1cb   :  { %v650_v47 = vmul.f32 1.442695, %v647_v45 }
 0x1cc   :  { %654 = vst.msk [vmem:[%s1061_s12] sm:$0xff] %vm50_vm0, %v652_v46 }
 0x1cd   :  { %759 = vpow2.f32 %v650_v47 }
 0x1d3   :  { %v760_v50 = vpop.eup %759 }
 0x1d4   :  { %v653_v53 = vadd.f32 1e-06, %v760_v50 }
 0x1d6   :  { %655 = vst.msk [vmem:[%s1061_s12 + $0x8] sm:$0xf] %vm578_vm14, %v653_v53 }

</bundles_post_ra>
